<compile_context>
chip_gen: v5e
topology: v5e:2x2
jax: 0.10.0
libtpu: 0.0.40
codegen_flags: <defaults>
</compile_context>

<pallas_src>
import functools
import math

import jax
import jax.numpy as jnp
import numpy as np
from jax.experimental import pallas as pl
from jax.experimental.pallas import tpu as pltpu


def _gaussian_weights_1d(size, sigma):
    """Normalized 1-D Gaussian taps (Python floats, compile-time constants).

    outer(w, w) equals GaussianBlurOperator._gaussian_kernel exactly: the 2-D
    Gaussian factorizes and its normalizer is the square of the 1-D sum.
    """
    xs = range(-size // 2 + 1, size // 2 + 1)
    w = [math.exp(-(t * t) / (2.0 * sigma * sigma)) for t in xs]
    s = sum(w)
    return tuple(v / s for v in w)


def _band_matrix(n, w1d, pad, dtype):
    """B with B[a, b] = w1d[b - a + pad] inside the band, 0 outside.

    (B @ x) blurs x along its leading axis with zero 'same' padding;
    (x @ B.T) blurs x along its trailing axis.  Built once in the wrapper.
    """
    ks = len(w1d)
    idx = np.arange(n)
    d = idx[None, :] - idx[:, None] + pad            # d[a, b] = b - a + pad
    w = np.asarray(w1d, dtype=np.float64)
    band = np.where((d >= 0) & (d < ks), w[np.clip(d, 0, ks - 1)], 0.0)
    return jnp.asarray(band, dtype=dtype)


def _blur_kernel(x_ref, bh_ref, bw_ref, o_ref, *, pb):
    """o[p] = B_H @ x[p] @ B_W for each of the pb plane groups in this block.

    x_ref : (pb, H, gW)  packed input planes (VMEM, auto-pipelined)
    bh_ref: (H, H)       vertical band matrix (constant across the grid)
    bw_ref: (gW, gW)     horizontal (block-diagonal) band matrix (constant)
    o_ref : (pb, H, gW)  packed output planes
    """
    bh = bh_ref[...]
    bw = bw_ref[...]
    for p in range(pb):
        # Horizontal pass on the MXU (contraction over the lane axis).
        t = jnp.dot(x_ref[p], bw, preferred_element_type=jnp.float32)
        # Vertical pass on the MXU (contraction over the sublane axis).
        t = jnp.dot(bh, t.astype(bh.dtype), preferred_element_type=jnp.float32)
        o_ref[p] = t.astype(o_ref.dtype)


def _round_up(v, m):
    return -(-v // m) * m


def _choose_group_batch(n_groups, h, gw, itemsize,
                        vmem_budget_bytes=40 << 20, max_unroll=32):
    """Largest divisor of n_groups whose double-buffered in+out blocks fit the
    VMEM budget, keeping >= 2 grid steps when possible (v7x megacore) and
    bounding the in-kernel unroll."""
    tile_bytes = _round_up(h, 8) * _round_up(gw, 128) * itemsize
    cap = n_groups if n_groups < 2 else max(1, n_groups // 2)
    cap = min(cap, max_unroll)
    best = 1
    for d in range(1, n_groups + 1):
        if n_groups % d == 0 and d <= cap and 4 * d * tile_bytes <= vmem_budget_bytes:
            best = d
    return best


def gaussian_blur(x, kernel_size=9, intensity=1.0):
    """Equivalent of GaussianBlurOperator(kernel_size, intensity).forward(x).

    x: (N, C, H, W); every channel is convolved with the same normalized
    Gaussian with zero 'same' padding (depthwise F.conv2d semantics).
    """
    assert kernel_size % 2 == 1, "kernel_size must be odd for 'same' padding"
    N, C, H, W = x.shape
    ks, pad = kernel_size, kernel_size // 2
    w1d = _gaussian_weights_1d(ks, intensity)

    # bf16 stays bf16 into the MXU; everything else computes in f32.
    band_dtype = jnp.bfloat16 if x.dtype == jnp.bfloat16 else jnp.float32
    itemsize = jnp.dtype(x.dtype).itemsize

    NC = N * C
    planes = x.reshape(NC, H, W)

    # Lane-dense packing: g planes side by side along the lane axis (g*W <= 128).
    g = 1
    if W < 128:
        g_target = max(1, 128 // W)
        for d in range(1, min(NC, g_target) + 1):
            if NC % d == 0:
                g = d
    ncg = NC // g
    gw = g * W

    if g > 1:
        xg = planes.reshape(ncg, g, H, W).transpose(0, 2, 1, 3).reshape(ncg, H, gw)
    else:
        xg = planes

    # Banded blur operators; zero outside the band == zero 'same' padding.
    bh = _band_matrix(H, w1d, pad, band_dtype)            # left-multiplies (H pass)
    bw = _band_matrix(W, w1d, pad, band_dtype).T          # right-multiplies (W pass)
    if g > 1:
        bw = jnp.kron(jnp.eye(g, dtype=band_dtype), bw)   # block-diag: no cross-plane bleed

    pb = _choose_group_batch(ncg, H, gw, itemsize)
    grid = (ncg // pb,)

    flops = 2 * ncg * H * gw * (gw + H)                   # two matmuls per plane group
    bytes_accessed = (2 * xg.size + bh.size + bw.size) * itemsize

    out = pl.pallas_call(
        functools.partial(_blur_kernel, pb=pb),
        grid=grid,
        in_specs=[
            pl.BlockSpec((pb, H, gw), lambda i: (i, 0, 0)),
            pl.BlockSpec((H, H), lambda i: (0, 0)),       # constant across grid
            pl.BlockSpec((gw, gw), lambda i: (0, 0)),     # constant across grid
        ],
        out_specs=pl.BlockSpec((pb, H, gw), lambda i: (i, 0, 0)),
        out_shape=jax.ShapeDtypeStruct((ncg, H, gw), x.dtype),
        compiler_params=pltpu.CompilerParams(
            dimension_semantics=("parallel",),
            vmem_limit_bytes=48 << 20,
        ),
        cost_estimate=pl.CostEstimate(
            flops=flops, transcendentals=0, bytes_accessed=bytes_accessed),
    )(xg, bh, bw)

    if g > 1:
        out = out.reshape(ncg, H, g, W).transpose(0, 2, 1, 3).reshape(NC, H, W)
    return out.reshape(N, C, H, W)


def _reference_blur_np(x, kernel_size=9, intensity=1.0):
    """Independent float64 depthwise conv2d (cross-correlation), zero 'same' pad."""
    x = np.asarray(x, dtype=np.float64)
    size, sigma = kernel_size, intensity
    ax = np.arange(-size // 2 + 1, size // 2 + 1, dtype=np.float64)
    xx, yy = np.meshgrid(ax, ax, indexing="ij")
    kern = np.exp(-(xx ** 2 + yy ** 2) / (2.0 * sigma ** 2))
    kern = kern / kern.sum()
    n, c, h, w = x.shape
    pad = size // 2
    xp = np.zeros((n, c, h + 2 * pad, w + 2 * pad), dtype=np.float64)
    xp[:, :, pad:pad + h, pad:pad + w] = x
    out = np.zeros_like(x)
    for i in range(size):
        for j in range(size):
            out += kern[i, j] * xp[:, :, i:i + h, j:j + w]
    return out


if __name__ == "__main__":
    key = jax.random.PRNGKey(0)
    N, C, H, W = 2, 4, 16, 16
    x = jax.random.normal(key, (N, C, H, W), dtype=jnp.float32)

    y = gaussian_blur(x, kernel_size=9, intensity=1.0)
    y = jax.block_until_ready(y)

    y_ref = _reference_blur_np(np.asarray(x), kernel_size=9, intensity=1.0)
    assert y.shape == (N, C, H, W)
    max_err = float(np.max(np.abs(np.asarray(y, dtype=np.float64) - y_ref)))
    assert max_err < 1e-3, f"max abs error vs reference: {max_err}"

    print("KERNEL_OK")
</pallas_src>

<mosaic_0001>
module attributes {stable_mosaic.version = 11 : i64} {
  func.func @_blur_kernel(%arg0: i32, %arg1: memref<1x16x128xf32, #tpu.memory_space<vmem>>, %arg2: memref<16x16xf32, #tpu.memory_space<vmem>>, %arg3: memref<128x128xf32, #tpu.memory_space<vmem>>, %arg4: memref<1x16x128xf32, #tpu.memory_space<vmem>>) attributes {dimension_semantics = [#tpu.dimension_semantics<parallel>], iteration_bounds = array<i64: 1>, scalar_prefetch = 0 : i64, scratch_operands = 0 : i64, tpu.core_type = #tpu.core_type<tc>, window_params = [{transform_indices = @transform_0, window_bounds = array<i64: 1, 16, 128>}, {pipeline_mode = #tpu.pipeline_mode<synchronous>, transform_indices = @transform_1, window_bounds = array<i64: 16, 16>}, {pipeline_mode = #tpu.pipeline_mode<synchronous>, transform_indices = @transform_2, window_bounds = array<i64: 128, 128>}, {transform_indices = @transform_3, window_bounds = array<i64: 1, 16, 128>}]} {
    %c0 = arith.constant 0 : index
    %c0_0 = arith.constant 0 : index
    %0 = vector.load %arg2[%c0, %c0_0] : memref<16x16xf32, #tpu.memory_space<vmem>>, vector<16x16xf32>
    %c0_1 = arith.constant 0 : index
    %c0_2 = arith.constant 0 : index
    %1 = vector.load %arg3[%c0_1, %c0_2] : memref<128x128xf32, #tpu.memory_space<vmem>>, vector<128x128xf32>
    %c0_3 = arith.constant 0 : index
    %c0_4 = arith.constant 0 : index
    %c0_5 = arith.constant 0 : index
    %2 = vector.load %arg1[%c0_3, %c0_4, %c0_5] : memref<1x16x128xf32, #tpu.memory_space<vmem>>, vector<1x16x128xf32>
    %3 = vector.shape_cast %2 : vector<1x16x128xf32> to vector<16x128xf32>
    %cst = arith.constant dense<0.000000e+00> : vector<16x128xf32>
    %4 = tpu.matmul %3, %1, %cst {dimension_numbers = #tpu.dot_dimension_numbers<[1], [0], [0], [1], [0, 0, 1, 1], [], []>} : vector<16x128xf32>, vector<128x128xf32>, vector<16x128xf32> -> vector<16x128xf32>
    %cst_6 = arith.constant dense<0.000000e+00> : vector<16x128xf32>
    %5 = tpu.matmul %0, %4, %cst_6 {dimension_numbers = #tpu.dot_dimension_numbers<[1], [0], [0], [1], [0, 0, 1, 1], [], []>} : vector<16x16xf32>, vector<16x128xf32>, vector<16x128xf32> -> vector<16x128xf32>
    %c0_7 = arith.constant 0 : index
    %c0_8 = arith.constant 0 : index
    %c0_9 = arith.constant 0 : index
    %6 = vector.load %arg4[%c0_7, %c0_8, %c0_9] : memref<1x16x128xf32, #tpu.memory_space<vmem>>, vector<1x16x128xf32>
    %7 = vector.shape_cast %6 : vector<1x16x128xf32> to vector<16x128xf32>
    %8 = vector.shape_cast %5 : vector<16x128xf32> to vector<1x16x128xf32>
    tpu.vector_store %arg4[%c0_7, %c0_8, %c0_9], %8 {strides = array<i32>} : memref<1x16x128xf32, #tpu.memory_space<vmem>>, vector<1x16x128xf32>,
    return
  }
  func.func @transform_0(%arg0: i32) -> (i32, i32, i32) {
    %c0_i32 = arith.constant 0 : i32
    %c0_i32_0 = arith.constant 0 : i32
    %c0_i32_1 = arith.constant 0 : i32
    return %arg0, %c0_i32, %c0_i32_0 : i32, i32, i32
  }
  func.func @transform_1(%arg0: i32) -> (i32, i32) {
    %c0_i32 = arith.constant 0 : i32
    %c0_i32_0 = arith.constant 0 : i32
    %c0_i32_1 = arith.constant 0 : i32
    return %c0_i32, %c0_i32_0 : i32, i32
  }
  func.func @transform_2(%arg0: i32) -> (i32, i32) {
    %c0_i32 = arith.constant 0 : i32
    %c0_i32_0 = arith.constant 0 : i32
    %c0_i32_1 = arith.constant 0 : i32
    return %c0_i32, %c0_i32_0 : i32, i32
  }
  func.func @transform_3(%arg0: i32) -> (i32, i32, i32) {
    %c0_i32 = arith.constant 0 : i32
    %c0_i32_0 = arith.constant 0 : i32
    %c0_i32_1 = arith.constant 0 : i32
    return %arg0, %c0_i32, %c0_i32_0 : i32, i32, i32
  }
}

</mosaic_0001>

<bundles_post_ra>
// kernel: tpu_custom_call.1
= control target key start
LH: loop header
LB: loop body
LE: loop exit
PB: predicated region body
PF: predicated region fallthrough
CT: control target
= control target key end

     0   :  { %8 = vsyncpa [#allocation3], 0  ;;  %s333_s0 = inlined_call_operand.hbm [shape: f32[1,16,128], index: 0, kind: input, shape index: {}]   ;;  %s334_s1 = inlined_call_operand.hbm [shape: f32[16,16], index: 1, kind: input, shape index: {}]   ;;  %s335_s2 = inlined_call_operand.hbm [shape: f32[128,128], index: 2, kind: input, shape index: {}]   ;;  %s336_s3 = inlined_call_operand.hbm [shape: f32[1,16,128], index: 3, kind: output, shape index: {}]  }
   0x1   :  { %9 = vsyncpa [#allocation6], 0 }
   0x2   :  { %10 = vsyncpa [#allocation4], 0  ;;  %s28_s14 = sshll.u32 %s334_s1, 4  ;;  %s283_s15 = smov [#allocation5]   ;;  %s29_s14 = int_to_ptr.hbm [resolvable:$true] %s28_s14 }
   0x3   :  { %s30_s16 = sshll.u32 %s283_s15, 4  ;;  %s15_s19 = sshll.u32 %s333_s0, 4  ;;  %s31_s16 = int_to_ptr.vmem [resolvable:$true] %s30_s16  ;;  %s16_s19 = int_to_ptr.hbm [resolvable:$true] %s15_s19 }
   0x4   :  { %s284_s20 = smov 128   ;;  %s285_s21 = smov 8  }
   0x5   :  { %36 = dma.hbm_to_vmem [thread:$0]  %s29_s14, 256, %s31_s16, [#allocation6], %s284_s20, %s284_s20, %s285_s21  }
   0x6   :  { %s286_s22 = smov [#allocation2]   ;;  %s41_s1 = sshll.u32 %s335_s2, 4  ;;  %s42_s1 = int_to_ptr.hbm [resolvable:$true] %s41_s1 }
   0x7   :  { %s17_s23 = sshll.u32 %s286_s22, 4  ;;  %s287_s0 = smov [#allocation7]   ;;  %s18_s23 = int_to_ptr.vmem [resolvable:$true] %s17_s23 }
   0x8   :  { %23 = dma.hbm_to_vmem [thread:$0]  %s16_s19, 256, %s18_s23, [#allocation3], %s284_s20, %s284_s20, %s285_s21  }
   0x9   :  { %s43_s26 = sshll.u32 %s287_s0, 4  ;;  %s44_s26 = int_to_ptr.vmem [resolvable:$true] %s43_s26 }
   0xa   :  { %49 = dma.hbm_to_vmem [thread:$0]  %s42_s1, 2048, %s44_s26, [#allocation6], %s284_s20, %s284_s20, %s285_s21  }
   0xb   :  { %277 = dma.done.wait [#allocation3], 256  }
   0xc   :  { %278 = vsyncadd [#allocation3], 4294967040 }
   0xd   :  { %279 = dma.done.wait [#allocation6], 2304  }
   0xe   :  { %280 = vsyncadd [#allocation6], 4294964992  ;;  %v79_v0 = vld [vmem:[#allocation7 + $0x78] sm:$0xff]  ;;  %v78_v1 = vld [vmem:[#allocation7 + $0x70] sm:$0xff]  ;;  %vm105_vm0 = vcmask 130048   ;;  %s288_s2 = smov [#allocation8]  }
   0xf   :  { %159 = vmatpush.msra.mxu2 %v79_v0  ;;  %82 = vmatpush.msra.mxu0 %v79_v0  ;;  %v77_v2 = vld [vmem:[#allocation7 + $0x68] sm:$0xff]  ;;  %v76_v3 = vld [vmem:[#allocation7 + $0x60] sm:$0xff]  ;;  %v75_v4 = vld [vmem:[#allocation7 + $0x58] sm:$0xff]  ;;  %s141_s27 = sshll.u32 %s288_s2, 4  ;;  %s143_s30 = sshll.u32 %s336_s3, 4  ;;  %s142_s27 = int_to_ptr.vmem [resolvable:$true] %s141_s27  ;;  %s144_s30 = int_to_ptr.hbm [resolvable:$true] %s143_s30 }
  0x10   :  { %v74_v5 = vld [vmem:[#allocation7 + $0x50] sm:$0xff]  ;;  %v73_v6 = vld [vmem:[#allocation7 + $0x48] sm:$0xff]  ;;  %v72_v7 = vld [vmem:[#allocation7 + $0x40] sm:$0xff] }
  0x11   :  { %160 = vmatpush.msra.mxu2 %v78_v1  ;;  %83 = vmatpush.msra.mxu0 %v78_v1  ;;  %v71_v8 = vld [vmem:[#allocation7 + $0x38] sm:$0xff]  ;;  %v70_v9 = vld [vmem:[#allocation7 + $0x30] sm:$0xff]  ;;  %v69_v10 = vld [vmem:[#allocation7 + $0x28] sm:$0xff] }
  0x12   :  { %v68_v11 = vld [vmem:[#allocation7 + $0x20] sm:$0xff]  ;;  %v67_v12 = vld [vmem:[#allocation7 + $0x18] sm:$0xff]  ;;  %v66_v13 = vld [vmem:[#allocation7 + $0x10] sm:$0xff] }
  0x13   :  { %161 = vmatpush.msra.mxu2 %v77_v2  ;;  %84 = vmatpush.msra.mxu0 %v77_v2  ;;  %v65_v14 = vld [vmem:[#allocation7 + $0x8] sm:$0xff]  ;;  %v64_v15 = vld [vmem:[#allocation7] sm:$0xff]  ;;  %v62_v20 = vld [vmem:[#allocation5] sm:$0xff] }
  0x14   :  { %v81_v16 = vld [vmem:[#allocation2 + $0x8] sm:$0xff]  ;;  %v80_v17 = vld [vmem:[#allocation2] sm:$0xff]  ;;  %v63_v21 = vld [vmem:[#allocation5 + $0x8] sm:$0xff] }
  0x15   :  { %162 = vmatpush.msra.mxu2 %v76_v3  ;;  %85 = vmatpush.msra.mxu0 %v76_v3 }
  0x17   :  { %163 = vmatpush.msra.mxu2 %v75_v4  ;;  %86 = vmatpush.msra.mxu0 %v75_v4 }
  0x19   :  { %164 = vmatpush.msra.mxu2 %v74_v5  ;;  %87 = vmatpush.msra.mxu0 %v74_v5 }
  0x1b   :  { %165 = vmatpush.msra.mxu2 %v73_v6  ;;  %88 = vmatpush.msra.mxu0 %v73_v6 }
  0x1d   :  { %166 = vmatpush.msra.mxu2 %v72_v7  ;;  %89 = vmatpush.msra.mxu0 %v72_v7 }
  0x1f   :  { %167 = vmatpush.msra.mxu2 %v71_v8  ;;  %90 = vmatpush.msra.mxu0 %v71_v8 }
  0x21   :  { %168 = vmatpush.msra.mxu2 %v70_v9  ;;  %91 = vmatpush.msra.mxu0 %v70_v9 }
  0x23   :  { %169 = vmatpush.msra.mxu2 %v69_v10  ;;  %92 = vmatpush.msra.mxu0 %v69_v10 }
  0x25   :  { %170 = vmatpush.msra.mxu2 %v68_v11  ;;  %93 = vmatpush.msra.mxu0 %v68_v11 }
  0x27   :  { %171 = vmatpush.msra.mxu2 %v67_v12  ;;  %94 = vmatpush.msra.mxu0 %v67_v12 }
  0x29   :  { %172 = vmatpush.msra.mxu2 %v66_v13  ;;  %95 = vmatpush.msra.mxu0 %v66_v13 }
  0x2b   :  { %173 = vmatpush.msra.mxu2 %v65_v14  ;;  %96 = vmatpush.msra.mxu0 %v65_v14 }
  0x2d   :  { %174 = vmatpush.msra.mxu2 %v64_v15  ;;  %97 = vmatpush.msra.mxu0 %v64_v15 }
  0x2e   :  { %101 = vmatmul.f32.vlgmr.msra.gmra.mxu2 %v81_v16  ;;  %98 = vmatmul.f32.vlgmr.msra.gmra.mxu0 %v80_v17 }
  0xab   :  { %v99_v19 = vpop.f32.mrf.mxu0 }
  0xb1   :  { %v102_v18 = vpop.f32.mrf.mxu2 }
  0xb2   :  { %126 = vmatpush.msra.mxu1 %v102_v18 }
  0xb4   :  { %127 = vmatpush.msra.mxu1 %v99_v19 }
  0xb5   :  { %157 = vmatmul.msk.f32.vlgmr.msra.gmra.mxu1 %vm105_vm0, %v62_v20 }
  0xbd   :  { %158 = vmatmul.msk.f32.gmra.mxu1 %vm105_vm0, %v63_v21 }
 0x132   :  { %v129_v22 = vpop.f32.mrf.mxu1 }
 0x133   :  { %135 = vst [vmem:[#allocation8] sm:$0xff] %v129_v22 }
 0x13a   :  { %v132_v23 = vpop.f32.mrf.mxu1 }
 0x13b   :  { %136 = vst [vmem:[#allocation8 + $0x8] sm:$0xff] %v132_v23 }
 0x13c   :  { %149 = dma.vmem_to_hbm [thread:$0]  %s142_s27, 256, %s144_s30, [#allocation4], %s284_s20, %s284_s20, %s285_s21  }
 0x13d   :  { %281 = dma.done.wait [#allocation4], 256  }
 0x13e   :  { %282 = vsyncadd [#allocation4], 4294967040 }
 0x13f   :  { %154 = vsyncpa [#allocation3], 1 }
 0x140   :  { %155 = vsyncpa [#allocation6], 1 }
 0x141   :  { %156 = vsyncpa [#allocation4], 1 }

</bundles_post_ra>
